<compile_context>
chip_gen: v7x
topology: tpu7x:2x2x1
jax: 0.10.0
libtpu: 0.0.40
codegen_flags: <defaults>
</compile_context>

<pallas_src>
import numpy as np
import jax
import jax.numpy as jnp
from jax import lax
from jax.experimental import pallas as pl
from jax.experimental.pallas import tpu as pltpu


def get_frequency_modes(seq_len, modes=64, mode_select_method='random'):
    """Same mode selection as the PyTorch module."""
    modes = min(modes, seq_len // 2)
    if mode_select_method == 'random':
        index = list(range(0, seq_len // 2))
        np.random.shuffle(index)
        index = index[:modes]
    else:
        index = list(range(0, modes))
    index.sort()
    return index


# ---------------------------------------------------------------------------
# Wrapper-side fold: rfft + complex mixing + irfft  ->  per-head real matrix W.
# ---------------------------------------------------------------------------
def precompute_fused_weights(weights1, weights2, index, seq_len):
    """Return W of shape (H, E*L, O*L) in bf16, or None if no mode survives.

    Hoist this out of the per-step path whenever the parameters are static
    (inference / eval): it is ordinary XLA work that only depends on the weights.
    """
    H, E, O, _ = weights1.shape
    L = seq_len
    n_rbins = L // 2 + 1

    # (wi, i) pairs that survive the in-loop guard of the PyTorch forward.
    # wi is the enumerate counter (weight slice AND out_ft bin) so it is always unique:
    # summing per-mode contributions is identical to the PyTorch loop's overwrite.
    kept = [(wi, i) for wi, i in enumerate(index) if i < n_rbins and wi < n_rbins]
    if not kept:
        return None
    freq_in = np.asarray([i for _, i in kept], dtype=np.float64)     # rfft modes read
    bin_out = np.asarray([wi for wi, _ in kept], dtype=np.float64)   # out_ft bins written
    wi_idx = np.asarray([wi for wi, _ in kept], dtype=np.int64)

    # Exact f64 per-mode rank-1 DFT kernels (numpy), downcast once to f32:
    #   out[.., o, t] = sum_{m,p} x[.., p] * ( Wr[..,o,m]*Kr[m,p,t] + Wi[..,o,m]*Ki[m,p,t] )
    n = np.arange(L, dtype=np.float64)
    cos_f = np.cos(2.0 * np.pi * np.outer(n, freq_in) / L)           # (L, M) rfft real basis
    sin_f = np.sin(2.0 * np.pi * np.outer(n, freq_in) / L)           # (L, M) rfft -imag basis
    # sparse irfft (torch "backward" norm); C2R drops the imag part of DC/Nyquist bins.
    herm = (bin_out[:, None] == 0) | ((L % 2 == 0) & (bin_out[:, None] == L // 2))
    c = np.where(herm, 1.0, 2.0)
    idft_c = c * np.cos(2.0 * np.pi * np.outer(bin_out, n) / L) / L                       # (M, L)
    idft_s = np.where(herm, 0.0, -c * np.sin(2.0 * np.pi * np.outer(bin_out, n) / L) / L)  # (M, L)
    kr = np.einsum('pm,mt->mpt', cos_f, idft_c) - np.einsum('pm,mt->mpt', sin_f, idft_s)   # (M,L,L)
    ki = np.einsum('pm,mt->mpt', cos_f, idft_s) + np.einsum('pm,mt->mpt', sin_f, idft_c)
    kr = jnp.asarray(kr, jnp.float32)
    ki = jnp.asarray(ki, jnp.float32)

    wr = weights1[:, :, :, wi_idx].astype(jnp.float32)               # (H, E, O, M)
    wi_ = weights2[:, :, :, wi_idx].astype(jnp.float32)
    # Construction stays f32/HIGHEST so the bf16 cast below is the only precision loss.
    w_fold = (jnp.einsum('heom,mpt->hepot', wr, kr, precision=lax.Precision.HIGHEST)
              + jnp.einsum('heom,mpt->hepot', wi_, ki, precision=lax.Precision.HIGHEST))
    # rows: e*L + p (input channel x time), cols: o*L + t (output channel x time)
    return w_fold.reshape(H, E * L, O * L).astype(jnp.bfloat16)


# ---------------------------------------------------------------------------
# Pallas kernel: one whole-block dot per head.
# ---------------------------------------------------------------------------
def _fourier_apply(x_hb, w_fold):
    """x_hb: (H, B, E*L) bf16, w_fold: (H, E*L, O*L) bf16 -> (H, B, O*L) f32."""
    H, B, EL = x_hb.shape
    OL = w_fold.shape[2]

    def kernel(x_ref, w_ref, o_ref):
        # Single MXU matmul per grid step: bf16 operands, f32 accumulate,
        # one unmasked full-block (B, O*L) store.
        o_ref[0] = jnp.dot(x_ref[0], w_ref[0], preferred_element_type=jnp.float32)

    return pl.pallas_call(
        kernel,
        out_shape=jax.ShapeDtypeStruct((H, B, OL), jnp.float32),
        grid=(H,),
        in_specs=[
            pl.BlockSpec((1, B, EL), lambda h: (h, 0, 0)),    # this head's activation slab
            pl.BlockSpec((1, EL, OL), lambda h: (h, 0, 0)),   # this head's fused weights
        ],
        out_specs=pl.BlockSpec((1, B, OL), lambda h: (h, 0, 0)),
        compiler_params=pltpu.CompilerParams(
            dimension_semantics=("parallel",)),               # megacore split over heads
    )(x_hb, w_fold)


def fourier_block_forward(q, k, v, mask, weights1, weights2, index):
    """FourierBlock.forward.  Returns (out, None); out has shape (B, H, O, L)."""
    del k, v, mask                     # unused, exactly like the PyTorch forward
    B, L, H, E = q.shape
    O = weights1.shape[2]

    w_fold = precompute_fused_weights(weights1, weights2, index, L)
    if w_fold is None:
        return jnp.zeros((B, H, O, L), jnp.float32), None

    # (B, L, H, E) -> (H, B, E*L): lane-dense rows (e outer, time inner) matching
    # w_fold's row ordering; reshape done in the wrapper, never in-kernel.
    x_hb = jnp.transpose(q, (2, 0, 3, 1)).reshape(H, B, E * L).astype(jnp.bfloat16)

    out = _fourier_apply(x_hb, w_fold)                        # (H, B, O*L) f32
    out = jnp.transpose(out.reshape(H, B, O, L), (1, 0, 2, 3))  # (B, H, O, L)
    return out, None


# ---------------------------------------------------------------------------
# Pure-JAX reference mirroring the PyTorch forward (complex arithmetic + FFT).
# ---------------------------------------------------------------------------
def reference_forward(q, weights1, weights2, index):
    B, L, H, E = q.shape
    O = weights1.shape[2]
    x = jnp.transpose(q, (0, 2, 3, 1)).astype(jnp.float32)           # (B,H,E,L)
    x_ft = jnp.fft.rfft(x, axis=-1)                                  # (B,H,E,L//2+1)
    w = (weights1 + 1j * weights2).astype(jnp.complex64)             # (H,E,O,M)
    out_ft = jnp.zeros((B, H, O, L // 2 + 1), jnp.complex64)
    for wi, i in enumerate(index):
        if i >= x_ft.shape[3] or wi >= out_ft.shape[3]:
            continue
        y = jnp.einsum('bhe,heo->bho', x_ft[:, :, :, i], w[:, :, :, wi],
                       precision=lax.Precision.HIGHEST)
        out_ft = out_ft.at[:, :, :, wi].set(y)
    # torch C2R (irfft) ignores the imaginary part of the DC / Nyquist bins.
    out_ft = out_ft.at[..., 0].set(out_ft[..., 0].real.astype(jnp.complex64))
    if L % 2 == 0:
        out_ft = out_ft.at[..., L // 2].set(out_ft[..., L // 2].real.astype(jnp.complex64))
    return jnp.fft.irfft(out_ft, n=L, axis=-1)


if __name__ == "__main__":
    # Small shapes consistent with the module: weights1 has shape
    # (n_heads, in_channels//n_heads, out_channels//n_heads, len(index)).
    B, L = 2, 32
    in_channels = out_channels = 64
    n_heads = 8
    E = in_channels // n_heads
    O = out_channels // n_heads
    modes = 8

    np.random.seed(0)                                  # deterministic 'random' mode selection
    index = get_frequency_modes(L, modes=modes, mode_select_method='random')

    key = jax.random.PRNGKey(0)
    kq, kk, kv, k1, k2 = jax.random.split(key, 5)
    q = jax.random.normal(kq, (B, L, n_heads, E), dtype=jnp.float32)
    k = jax.random.normal(kk, (B, L, n_heads, E), dtype=jnp.float32)   # unused in forward
    v = jax.random.normal(kv, (B, L, n_heads, E), dtype=jnp.float32)   # unused in forward
    mask = None                                                        # unused in forward

    # weights = scale * rand(...) as in the module (uniform [0,1) real & imag parts).
    scale = 1.0 / (in_channels * out_channels)
    weights1 = scale * jax.random.uniform(k1, (n_heads, E, O, len(index)), dtype=jnp.float32)
    weights2 = scale * jax.random.uniform(k2, (n_heads, E, O, len(index)), dtype=jnp.float32)

    out, _ = fourier_block_forward(q, k, v, mask, weights1, weights2, index)
    out = jax.block_until_ready(out)

    ref = jax.block_until_ready(reference_forward(q, weights1, weights2, index))

    err = float(jnp.max(jnp.abs(out - ref)))
    ref_scale = float(jnp.max(jnp.abs(ref)))
    # bf16 MXU operands (f32 accumulate) -> bf16-level tolerance relative to output magnitude.
    tol = 3e-2 * ref_scale + 1e-6
    if not err <= tol:
        raise AssertionError(
            f"Pallas kernel mismatch: max|diff|={err:.3e}, max|ref|={ref_scale:.3e}, tol={tol:.3e}")
    print("KERNEL_OK")
</pallas_src>

<mosaic_0001>
module attributes {stable_mosaic.version = 11 : i64} {
  func.func @kernel(%arg0: i32, %arg1: memref<1x2x256xbf16, #tpu.memory_space<vmem>>, %arg2: memref<1x256x256xbf16, #tpu.memory_space<vmem>>, %arg3: memref<1x2x256xf32, #tpu.memory_space<vmem>>) attributes {dimension_semantics = [#tpu.dimension_semantics<parallel>], iteration_bounds = array<i64: 8>, scalar_prefetch = 0 : i64, scratch_operands = 0 : i64, tpu.core_type = #tpu.core_type<tc>, window_params = [{transform_indices = @transform_0, window_bounds = array<i64: 1, 2, 256>}, {transform_indices = @transform_1, window_bounds = array<i64: 1, 256, 256>}, {transform_indices = @transform_2, window_bounds = array<i64: 1, 2, 256>}]} {
    %c0 = arith.constant 0 : index
    %c0_0 = arith.constant 0 : index
    %c0_1 = arith.constant 0 : index
    %0 = vector.load %arg1[%c0, %c0_0, %c0_1] : memref<1x2x256xbf16, #tpu.memory_space<vmem>>, vector<1x2x256xbf16>
    %1 = vector.shape_cast %0 : vector<1x2x256xbf16> to vector<2x256xbf16>
    %c0_2 = arith.constant 0 : index
    %c0_3 = arith.constant 0 : index
    %c0_4 = arith.constant 0 : index
    %2 = vector.load %arg2[%c0_2, %c0_3, %c0_4] : memref<1x256x256xbf16, #tpu.memory_space<vmem>>, vector<1x256x256xbf16>
    %3 = vector.shape_cast %2 : vector<1x256x256xbf16> to vector<256x256xbf16>
    %cst = arith.constant dense<0.000000e+00> : vector<2x256xf32>
    %4 = tpu.matmul %1, %3, %cst {dimension_numbers = #tpu.dot_dimension_numbers<[1], [0], [0], [1], [0, 0, 1, 1], [], []>} : vector<2x256xbf16>, vector<256x256xbf16>, vector<2x256xf32> -> vector<2x256xf32>
    %c0_5 = arith.constant 0 : index
    %c0_6 = arith.constant 0 : index
    %c0_7 = arith.constant 0 : index
    %5 = vector.load %arg3[%c0_5, %c0_6, %c0_7] : memref<1x2x256xf32, #tpu.memory_space<vmem>>, vector<1x2x256xf32>
    %6 = vector.shape_cast %5 : vector<1x2x256xf32> to vector<2x256xf32>
    %7 = vector.shape_cast %4 : vector<2x256xf32> to vector<1x2x256xf32>
    tpu.vector_store %arg3[%c0_5, %c0_6, %c0_7], %7 {strides = array<i32>} : memref<1x2x256xf32, #tpu.memory_space<vmem>>, vector<1x2x256xf32>,
    return
  }
  func.func @transform_0(%arg0: i32) -> (i32, i32, i32) {
    %c0_i32 = arith.constant 0 : i32
    %c0_i32_0 = arith.constant 0 : i32
    %c0_i32_1 = arith.constant 0 : i32
    return %arg0, %c0_i32, %c0_i32_0 : i32, i32, i32
  }
  func.func @transform_1(%arg0: i32) -> (i32, i32, i32) {
    %c0_i32 = arith.constant 0 : i32
    %c0_i32_0 = arith.constant 0 : i32
    %c0_i32_1 = arith.constant 0 : i32
    return %arg0, %c0_i32, %c0_i32_0 : i32, i32, i32
  }
  func.func @transform_2(%arg0: i32) -> (i32, i32, i32) {
    %c0_i32 = arith.constant 0 : i32
    %c0_i32_0 = arith.constant 0 : i32
    %c0_i32_1 = arith.constant 0 : i32
    return %arg0, %c0_i32, %c0_i32_0 : i32, i32, i32
  }
}

</mosaic_0001>

<bundles_post_ra>
// kernel: tpu_custom_call.1
= control target key start
LH: loop header
LB: loop body
LE: loop exit
PB: predicated region body
PF: predicated region fallthrough
CT: control target
= control target key end

     0   :  { %7 = vsyncpa [#allocation3], 0  ;;  %s1137_s0 = inlined_call_operand.hbm [shape: bf16[8,2,256], index: 0, kind: input, shape index: {}]   ;;  %s1138_s1 = inlined_call_operand.hbm [shape: bf16[8,256,256], index: 1, kind: input, shape index: {}]   ;;  %s1139_s2 = inlined_call_operand.hbm [shape: f32[8,2,256], index: 2, kind: output, shape index: {}]  }
   0x1   :  { %9 = vsyncpa [#allocation3 + $0x1], 0 }
   0x2   :  { %10 = vsyncpa [#allocation6], 0 }
   0x3   :  { %12 = vsyncpa [#allocation6 + $0x1], 0 }
   0x4   :  { %13 = vsyncpa [#allocation4], 0 }
   0x5   :  { %15 = vsyncpa [#allocation4 + $0x1], 0  ;;  %s889_s9 = smov 0   ;;  %s891_s10 = smov 0  }
   0x6   :  { %s893_s11 = smov 0   ;;  %s895_s12 = smov 0  }
   0x7 LB: > { %s910_s13 = sadd.s32 4294967295, %s866_s12   ;;  %s579_s14 = sadd.s32 4294967294, %s866_s12   ;;  %s866_s12 = sphi %s895_s12, %s1156_s12   ;;  %s862_s11 = sphi %s893_s11, %s1155_s11   ;;  %s858_s10 = sphi %s891_s10, %s1154_s10   ;;  %s854_s9 = sphi %s889_s9, %s1153_s9  }
   0x8   : > { %s914_s15 = sadd.s32 1, %s866_s12   ;;  %s28_s16 = sadd.s32 1, %s862_s11 }
   0x9   : > { %s25_s17 = ssub.s32 %s866_s12, %s914_s15  ;;  %p35_p0 = scmp.ne.s32.totalorder %s862_s11, %s858_s10 }
   0xa   : > { %p26_p1 = scmp.eq.s32.totalorder %s25_s17, 0  ;;  %p36_p2 = scmp.eq.s32.totalorder %s866_s12, 0 }
   0xb   : > { %p41_p3 = scmp.ne.s32.totalorder %s858_s10, %s854_s9  ;;  %p42_p4 = scmp.eq.s32.totalorder %s910_s13, 0 }
   0xc   : > { %s926_s18 = scalar_select %p26_p1, %s862_s11, %s28_s16  }
   0xd   : > { %p928_p5 = por %p36_p2, %p35_p0  ;;  %p932_p6 = por %p42_p4, %p41_p3 }
   0xe   : > { %p91_p7 = scmp.eq.s32.totalorder %s910_s13, 7  ;;  %p97_p8 = scmp.eq.s32.totalorder %s579_s14, 7 }
   0xf   : > { %s1143_s20 = scalar_select %p932_p6, 1, 0 }
  0x10   : > { %p651_p9 = scmp.lt.s32.totalorder %s866_s12, 8  ;;  %p938_p10 = por %p91_p7, %p35_p0 }
  0x11   : > { %p942_p11 = por %p97_p8, %p41_p3  ;;  %s947_s23 = sand.u32 1, %s862_s11  }
  0x12   : > { %s1144_s21 = scalar_select %p938_p10, 1, 0 }
  0x13   : > { %s1145_s22 = scalar_select %p942_p11, 1, 0 }
  0x14   : > { %s631_s24 = sshll.u32 %s866_s12, 5  ;;  %s582_s25 = sshll.u32 %s947_s23, 1 }
  0x15   : > { %s954_s28 = scalar_lea.hbm %s1137_s0, %s631_s24  ;;  %s121_s29 = scalar_lea.vmem [#allocation2], %s582_s25 }
  0x16   : > { %s129_s30 = sshll.u32 %s121_s29, 4  ;;  %p958_p12 = pnand %p651_p9, %p928_p5  ;;  %s962_s30 = int_to_ptr.vmem [resolvable:$true] %s129_s30 }
  0x17   : > { %s118_s4 = scalar_lea.sflag [#allocation3], %s947_s23  ;;  %s736_s5 = scalar_lea.hbm %s954_s28, 32 }
  0x18   : > { %p737_p1 = scmp.ne.s32.totalorder %s954_s28, %s736_s5  ;;  %p738_p2 = pneg %p958_p12 }
  0x19   : > { %s741_s8 = scalar_lea.hbm %s1137_s0, 256  ;;  %p742_p5 = scmp.lt.u32.totalorder %s954_s28, %s1137_s0 }
  0x1a   : > { %p739_p3 = pnand %p738_p2, %p737_p1  ;;  %p743_p7 = scmp.lt.u32.totalorder %s741_s8, %s736_s5 }
  0x1b   : > { %p745_p9 = scmp.lt.u32.totalorder %s736_s5, %s954_s28 }
  0x1c   : > { %p740_p4 = pneg %p739_p3  ;;  %p744_p8 = por %p743_p7, %p742_p5 }
  0x1e   : > { %p746_p13 = por %p745_p9, %p744_p8 }
  0x20   : > { %p747_p0 = pnand %p746_p13, %p740_p4 }
  0x22   : > { %750 = shalt.err (!%p747_p0)
}
  0x23   : > { %s751_s17 = scalar_lea.vmem %s962_s30, 32  ;;  %s868_s19 = smov [#allocation2]  }
  0x24   : > { %p752_p1 = scmp.ne.s32.totalorder %s962_s30, %s751_s17  ;;  %s756_s24 = sshll.u32 %s868_s19, 4  ;;  %s757_s24 = int_to_ptr.vmem [resolvable:$false] %s756_s24 }
  0x25   : > { %s758_s25 = scalar_lea.vmem %s757_s24, 64  ;;  %p759_p10 = scmp.lt.s32.totalorder %s962_s30, %s757_s24 }
  0x26   : > { %p754_p3 = pnand %p752_p1, %p738_p2  ;;  %p760_p5 = scmp.lt.s32.totalorder %s758_s25, %s751_s17 }
  0x28   : > { %p755_p11 = pneg %p754_p3  ;;  %p761_p7 = por %p760_p5, %p759_p10 }
  0x2a   : > { %p762_p8 = pnand %p761_p7, %p755_p11 }
  0x2c   : > { %765 = shalt.err (!%p762_p8)
}
  0x2d   : > { %643 = dma.hbm_to_vmem [thread:$0]  (!%p958_p12), %s954_s28, 32, %s962_s30, %s118_s4  }
  0x2e   : > { %p1147_p13 = scmp.lt.s32.totalorder %s866_s12, 9  ;;  %p1148_p0 = scmp.ge.s32.totalorder %s866_s12, 1 }
  0x2f   : > { %s585_s27 = sshll.u32 %s947_s23, 8  ;;  %s632_s29 = sshll.u32 %s866_s12, 12 }
  0x30   : > { %p996_p4 = pnand %p1148_p0, %p1147_p13  ;;  %s1005_s7 = scalar_lea.hbm %s1138_s1, %s632_s29 }
  0x31   : > { %s140_s8 = scalar_lea.vmem [#allocation5], %s585_s27  ;;  %s137_s28 = scalar_lea.sflag [#allocation6], %s947_s23 }
  0x32   : > { %s147_s14 = sshll.u32 %s140_s8, 4  ;;  %s766_s30 = scalar_lea.hbm %s1005_s7, 4096  ;;  %s1007_s14 = int_to_ptr.vmem [resolvable:$true] %s147_s14 }
  0x33   : > { %p767_p10 = scmp.ne.s32.totalorder %s1005_s7, %s766_s30  ;;  %s771_s17 = scalar_lea.hbm %s1138_s1, 32768 }
  0x34   : > { %p772_p1 = scmp.lt.u32.totalorder %s1005_s7, %s1138_s1  ;;  %p773_p3 = scmp.lt.u32.totalorder %s771_s17, %s766_s30 }
  0x35   : > { %p769_p11 = pnand %p767_p10, %p738_p2  ;;  %p775_p7 = scmp.lt.u32.totalorder %s766_s30, %s1005_s7 }
  0x36   : > { %p774_p5 = por %p773_p3, %p772_p1 }
  0x37   : > { %p770_p9 = pneg %p769_p11 }
  0x38   : > { %p776_p8 = por %p775_p7, %p774_p5 }
  0x3a   : > { %p777_p13 = pnand %p776_p8, %p770_p9 }
  0x3c   : > { %780 = shalt.err (!%p777_p13)
}
  0x3d   : > { %s781_s25 = scalar_lea.vmem %s1007_s14, 4096  ;;  %s869_s27 = smov [#allocation5]  }
  0x3e   : > { %p782_p0 = scmp.ne.s32.totalorder %s1007_s14, %s781_s25  ;;  %s786_s29 = sshll.u32 %s869_s27, 4  ;;  %s787_s29 = int_to_ptr.vmem [resolvable:$false] %s786_s29 }
  0x3f   : > { %s788_s5 = scalar_lea.vmem %s787_s29, 8192  ;;  %p789_p6 = scmp.lt.s32.totalorder %s1007_s14, %s787_s29 }
  0x40   : > { %p784_p10 = pnand %p782_p0, %p738_p2  ;;  %p790_p1 = scmp.lt.s32.totalorder %s788_s5, %s781_s25 }
  0x42   : > { %p785_p11 = pneg %p784_p10  ;;  %p791_p3 = por %p790_p1, %p789_p6 }
  0x44   : > { %p792_p5 = pnand %p791_p3, %p785_p11 }
  0x46   : > { %795 = shalt.err (!%p792_p5)
}
  0x47   : > { %s870_s6 = smov 128   ;;  %s871_s8 = smov 8  }
  0x48   : > { %646 = dma.hbm_to_vmem [thread:$0]  (!%p958_p12), %s1005_s7, 4096, %s1007_s14, %s137_s28, %s870_s6, %s870_s6, %s871_s8  }
  0x49   : > { %159 = sbr.rel (%p996_p4) target bundleno = 378 (0x17a), region = 28  ;;  %s1038_s30 = sand.u32 (!%p996_p4), 1, %s858_s10  }
  0x4a   : > { %s589_s4 = sshll.u32 (!%p996_p4), %s1038_s30, 1  ;;  %s162_s16 = scalar_lea.sflag (!%p996_p4), [#allocation3], %s1038_s30 }
  0x4b   : > { %s1042_s17 = scalar_lea.vmem (!%p996_p4), [#allocation2], %s589_s4  ;;  %p1150_p6 = scmp.ne.s32.totalorder (!%p996_p4), %s1143_s20, 0 }
  0x50   : > { %841 = dma.done.wait (%p1150_p6), %s162_s16, 32  }
  0x51   : > { %843 = vsyncadd (%p1150_p6), %s162_s16, 4294967264  ;;  %s590_s23 = sshll.u32 %s1038_s30, 8  ;;  %s171_s3 = scalar_lea.sflag [#allocation6], %s1038_s30 }
  0x52   : > { %s1050_s26 = scalar_lea.vmem [#allocation5], %s590_s23 }
  0x53   : > { %845 = dma.done.wait (%p1150_p6), %s171_s3, 4096  }
  0x54   : > { %847 = vsyncadd (%p1150_p6), %s171_s3, 4294963200  ;;  %v688_v0 = vld [vmem:[%s1050_s26 + $0x4] ss:$8 sps:$4 sm:$0xff]   ;;  %v690_v1 = vld [vmem:[%s1050_s26] ss:$8 sps:$4 sm:$0xff]   ;;  %v245_v11 = vlaneseq  ;;  %s591_s20 = sshll.u32 %s1038_s30, 2 }
  0x55   : > { %418 = vmatprep.subr.bf16.mxu0 %v688_v0  ;;  %v691_v2 = vld [vmem:[%s1050_s26 + $0x14] ss:$8 sps:$4 sm:$0xff]   ;;  %v693_v3 = vld [vmem:[%s1050_s26 + $0x10] ss:$8 sps:$4 sm:$0xff]   ;;  %v694_v4 = vld [vmem:[%s1050_s26 + $0x24] ss:$8 sps:$4 sm:$0xff]  }
  0x56   : > { %419 = vmatpush1.bf16.msra.mxu0 %v690_v1  ;;  %v696_v5 = vld [vmem:[%s1050_s26 + $0x20] ss:$8 sps:$4 sm:$0xff]   ;;  %v697_v6 = vld [vmem:[%s1050_s26 + $0x34] ss:$8 sps:$4 sm:$0xff]   ;;  %v699_v7 = vld [vmem:[%s1050_s26 + $0x30] ss:$8 sps:$4 sm:$0xff]  }
  0x57   : > { %420 = vmatprep.subr.bf16.mxu0 %v691_v2  ;;  %v700_v8 = vld [vmem:[%s1050_s26 + $0x44] ss:$8 sps:$4 sm:$0xff]   ;;  %v872_v9 = vmov 1966171168   ;;  %v702_v12 = vld [vmem:[%s1050_s26 + $0x40] ss:$8 sps:$4 sm:$0xff]  }
  0x58   : > { %v243_v10 = vunpack.c.l.s4 %v872_v9  ;;  %v703_v13 = vld [vmem:[%s1050_s26 + $0x54] ss:$8 sps:$4 sm:$0xff]   ;;  %v246_v15 = vshrl.u32 %v245_v11, 7  ;;  %v705_v16 = vld [vmem:[%s1050_s26 + $0x50] ss:$8 sps:$4 sm:$0xff]   ;;  %s633_s7 = sshll.u32 %s910_s13, 6 }
  0x59   : > { %v706_v17 = vld [vmem:[%s1050_s26 + $0x64] ss:$8 sps:$4 sm:$0xff]   ;;  %v592_v19 = vld.sshfl [vmem:[%s1042_s17] sm:$0x11 pattern:$0x75316420]  ;;  %s1094_s25 = scalar_lea.hbm %s1139_s2, %s633_s7 }
  0x5a   : > { %421 = vmatpush1.bf16.msra.mxu0 %v693_v3  ;;  %v244_v14 = vunpack.c.0.s8 %v243_v10  ;;  %v241_v20 = vcombine.high %v592_v19, %v592_v19  ;;  %v708_v21 = vld [vmem:[%s1050_s26 + $0x60] ss:$8 sps:$4 sm:$0xff]   ;;  %v709_v22 = vld [vmem:[%s1050_s26 + $0x74] ss:$8 sps:$4 sm:$0xff]   ;;  %v711_v24 = vld [vmem:[%s1050_s26 + $0x70] ss:$8 sps:$4 sm:$0xff]  }
  0x5b   : > { %422 = vmatprep.subr.bf16.mxu0 %v694_v4  ;;  %v712_v25 = vld [vmem:[%s1050_s26 + $0x84] ss:$8 sps:$4 sm:$0xff]   ;;  %v714_v26 = vld [vmem:[%s1050_s26 + $0x80] ss:$8 sps:$4 sm:$0xff]   ;;  %v715_v27 = vld [vmem:[%s1050_s26 + $0x94] ss:$8 sps:$4 sm:$0xff]  }
  0x5c   : > { %v247_v18 = vsub.s32 %v244_v14, %v246_v15  ;;  %v717_v28 = vld [vmem:[%s1050_s26 + $0x90] ss:$8 sps:$4 sm:$0xff]   ;;  %v718_v29 = vld [vmem:[%s1050_s26 + $0xa4] ss:$8 sps:$4 sm:$0xff]   ;;  %v720_v30 = vld [vmem:[%s1050_s26 + $0xa0] ss:$8 sps:$4 sm:$0xff]  }
  0x5d   : > { %v721_v31 = vld [vmem:[%s1050_s26 + $0xb4] ss:$8 sps:$4 sm:$0xff]   ;;  %v723_v32 = vld [vmem:[%s1050_s26 + $0xb0] ss:$8 sps:$4 sm:$0xff]   ;;  %v724_v33 = vld [vmem:[%s1050_s26 + $0xc4] ss:$8 sps:$4 sm:$0xff]  }
  0x5e   : > { %423 = vmatpush1.bf16.msra.mxu0 %v696_v5  ;;  %v255_v23 = vrot.slane %v241_v20, %v247_v18  ;;  %v726_v34 = vld [vmem:[%s1050_s26 + $0xc0] ss:$8 sps:$4 sm:$0xff]   ;;  %v727_v35 = vld [vmem:[%s1050_s26 + $0xd4] ss:$8 sps:$4 sm:$0xff]   ;;  %v729_v36 = vld [vmem:[%s1050_s26 + $0xd0] ss:$8 sps:$4 sm:$0xff]   ;;  %v248_v41 = vrot.slane %v592_v19, %v247_v18 }
  0x5f   : > { %424 = vmatprep.subr.bf16.mxu0 %v697_v6  ;;  %v730_v37 = vld [vmem:[%s1050_s26 + $0xe4] ss:$8 sps:$4 sm:$0xff]   ;;  %v732_v38 = vld [vmem:[%s1050_s26 + $0xe0] ss:$8 sps:$4 sm:$0xff]   ;;  %v733_v39 = vld [vmem:[%s1050_s26 + $0xf4] ss:$8 sps:$4 sm:$0xff]  }
  0x60   : > { %450 = vmatprep.mubr.bf16.mxu0 %v255_v23  ;;  %v735_v40 = vld [vmem:[%s1050_s26 + $0xf0] ss:$8 sps:$4 sm:$0xff]   ;;  %s199_s14 = scalar_lea.vmem [#allocation7], %s591_s20  ;;  %s472_s27 = scalar_lea.sflag [#allocation4], %s1038_s30 }
  0x61   : > { %s486_s28 = sshll.u32 %s199_s14, 4  ;;  %p1151_p2 = scmp.ne.s32.totalorder %s1144_s21, 0  ;;  %s1096_s28 = int_to_ptr.vmem [resolvable:$true] %s486_s28 }
  0x62   : > { %425 = vmatpush1.bf16.msra.mxu0 %v699_v7  ;;  %s796_s13 = scalar_lea.vmem %s1096_s28, 64  ;;  %s873_s29 = smov [#allocation7]  }
  0x63   : > { %426 = vmatprep.subr.bf16.mxu0 %v700_v8  ;;  %p797_p12 = scmp.ne.s32.totalorder %s1096_s28, %s796_s13  ;;  %s800_s5 = sshll.u32 %s873_s29, 4  ;;  %s801_s5 = int_to_ptr.vmem [resolvable:$false] %s800_s5 }
  0x64   : > { %s802_s6 = scalar_lea.vmem %s801_s5, 128  ;;  %p803_p7 = scmp.lt.s32.totalorder %s1096_s28, %s801_s5 }
  0x65   : > { %p798_p4 = pnand %p797_p12, %p1151_p2  ;;  %p804_p8 = scmp.lt.s32.totalorder %s802_s6, %s796_s13 }
  0x66   : > { %427 = vmatpush1.bf16.msra.mxu0 %v702_v12 }
  0x67   : > { %428 = vmatprep.subr.bf16.mxu0 %v703_v13  ;;  %p799_p9 = pneg %p798_p4  ;;  %p805_p13 = por %p804_p8, %p803_p7 }
  0x69   : > { %p806_p0 = pnand %p805_p13, %p799_p9 }
  0x6a   : > { %429 = vmatpush1.bf16.msra.mxu0 %v705_v16 }
  0x6b   : > { %430 = vmatprep.subr.bf16.mxu0 %v706_v17 }
  0x6e   : > { %431 = vmatpush1.bf16.msra.mxu0 %v708_v21 }
  0x6f   : > { %432 = vmatprep.subr.bf16.mxu0 %v709_v22 }
  0x72   : > { %433 = vmatpush1.bf16.msra.mxu0 %v711_v24 }
  0x73   : > { %434 = vmatprep.subr.bf16.mxu0 %v712_v25 }
  0x76   : > { %435 = vmatpush1.bf16.msra.mxu0 %v714_v26 }
  0x77   : > { %436 = vmatprep.subr.bf16.mxu0 %v715_v27 }
  0x7a   : > { %437 = vmatpush1.bf16.msra.mxu0 %v717_v28 }
  0x7b   : > { %438 = vmatprep.subr.bf16.mxu0 %v718_v29 }
  0x7e   : > { %439 = vmatpush1.bf16.msra.mxu0 %v720_v30 }
  0x7f   : > { %440 = vmatprep.subr.bf16.mxu0 %v721_v31 }
  0x82   : > { %441 = vmatpush1.bf16.msra.mxu0 %v723_v32 }
  0x83   : > { %442 = vmatprep.subr.bf16.mxu0 %v724_v33 }
  0x86   : > { %443 = vmatpush1.bf16.msra.mxu0 %v726_v34 }
  0x87   : > { %444 = vmatprep.subr.bf16.mxu0 %v727_v35 }
  0x8a   : > { %445 = vmatpush1.bf16.msra.mxu0 %v729_v36 }
  0x8b   : > { %446 = vmatprep.subr.bf16.mxu0 %v730_v37 }
  0x8e   : > { %447 = vmatpush1.bf16.msra.mxu0 %v732_v38 }
  0x8f   : > { %448 = vmatprep.subr.bf16.mxu0 %v733_v39 }
  0x92   : > { %449 = vmatpush1.bf16.msra.mxu0 %v735_v40 }
  0x95   : > { %451 = vmatmul.mubr.bf16.vlgmr.msra.gmra.mrb[0].mxu0 %v248_v41 }
 0x168   : > { %v452_v42 = vpop.f32.mrb[0].mxu0 }
 0x169   : > { %v454_v43 = vpop.f32.mrb[1].mxu0 }
 0x16a   : > { %v461_v44 = vcombine.low %v452_v42, %v454_v43  ;;  %v456_v45 = vpop.f32.mrb[2].mxu0 }
 0x16b   : > { %v457_v46 = vpop.f32.mrb[3].mxu0 }
 0x16c   : > { %625 = vst.sshfl [vmem:[%s199_s14] sm:$0x33 pattern:$0x76325410] %v461_v44 }
 0x16d   : > { %809 = shalt.err (!%p806_p0)
}
 0x16e   : > { %s810_s8 = scalar_lea.hbm %s1094_s25, 64  ;;  %s814_s16 = scalar_lea.hbm %s1139_s2, 512 }
 0x16f   : > { %p811_p10 = scmp.ne.s32.totalorder %s1094_s25, %s810_s8  ;;  %p815_p3 = scmp.lt.u32.totalorder %s1094_s25, %s1139_s2 }
 0x170   : > { %p816_p5 = scmp.lt.u32.totalorder %s814_s16, %s810_s8  ;;  %p818_p12 = scmp.lt.u32.totalorder %s810_s8, %s1094_s25 }
 0x171   : > { %p812_p11 = pnand %p811_p10, %p1151_p2 }
 0x172   : > { %p817_p6 = por %p816_p5, %p815_p3 }
 0x173   : > { %p813_p1 = pneg %p812_p11 }
 0x174   : > { %p819_p4 = por %p818_p12, %p817_p6 }
 0x176   : > { %p820_p9 = pnand %p819_p4, %p813_p1 }
 0x178   : > { %823 = shalt.err (!%p820_p9)
}
 0x179   : > { %638 = dma.vmem_to_hbm [thread:$0]  (%p1151_p2), %s1096_s28, 64, %s1094_s25, %s472_s27  }
 0x17a PF: > { %p652_p7 = scmp.ge.s32.totalorder %s866_s12, 2  ;;  %s498_s3 = sand.u32 1, %s854_s9  }
 0x17b   : > { %p1152_p8 = scmp.ne.s32.totalorder %s1145_s22, 0  ;;  %s499_s26 = scalar_lea.sflag [#allocation4], %s498_s3 }
 0x17d   : > { %p648_p13 = pnand %p652_p7, %p1152_p8 }
 0x17f   : > { %849 = dma.done.wait (!%p648_p13), %s499_s26, 64  }
 0x180   : > { %851 = vsyncadd (!%p648_p13), %s499_s26, 4294967232  ;;  %p18_p0 = scmp.ge.s32.totalorder %s914_s15, 10   ;;  %s1153_s9 = smov %s858_s10 }
 0x181   : > { %s1154_s10 = smov %s862_s11  ;;  %s1155_s11 = smov %s926_s18 }
 0x182   : > { %s1156_s12 = smov %s914_s15  ;;  %20 = sbr.rel (!%p18_p0) target bundleno = 7 (0x7), region = 86 }
 0x189   :  { %504 = vsyncpa [#allocation3], 1 }
 0x18a   :  { %506 = vsyncpa [#allocation3 + $0x1], 1 }
 0x18b   :  { %507 = vsyncpa [#allocation6], 1 }
 0x18c   :  { %509 = vsyncpa [#allocation6 + $0x1], 1 }
 0x18d   :  { %510 = vsyncpa [#allocation4], 1 }
 0x18e   :  { %512 = vsyncpa [#allocation4 + $0x1], 1 }

</bundles_post_ra>
